<compile_context>
chip_gen: v5e
topology: v5e:2x2
jax: 0.10.0
libtpu: 0.0.40
codegen_flags: <defaults>
</compile_context>

<pallas_src>
import functools

import jax
import jax.numpy as jnp
from jax import lax
from jax.experimental import pallas as pl
from jax.experimental.pallas import tpu as pltpu


# ----------------------------------------------------------------------------
# Fused kernel: point-wise conv + argmax/one-hot (post_pred) +
# label one-hot (post_label) + Dice partial sums (Evaluator).
# ----------------------------------------------------------------------------
def _fused_infer_kernel(
    w_ref,        # SMEM (K, C_in) f32
    b_ref,        # SMEM (K,)      f32
    x_ref,        # VMEM (C_in, T) f32
    lab_ref,      # VMEM (1, T)    int32
    pred_ref,     # VMEM out (K, T) f32
    laboh_ref,    # VMEM out (K, T) f32
    dice_ref,     # VMEM out (K, 1) f32  (resident across the S axis)
    inter_sc,     # VMEM scratch (K, 1) f32
    psum_sc,      # VMEM scratch (K, 1) f32
    lsum_sc,      # VMEM scratch (K, 1) f32
):
    si = pl.program_id(1)
    n_s = pl.num_programs(1)
    c_in, t = x_ref.shape
    k = pred_ref.shape[0]

    @pl.when(si == 0)
    def _():
        inter_sc[...] = jnp.zeros_like(inter_sc)
        psum_sc[...] = jnp.zeros_like(psum_sc)
        lsum_sc[...] = jnp.zeros_like(lsum_sc)

    x = x_ref[...]                                   # (C_in, T) f32

    # ---- point-wise conv: K*C_in scalar*vector FMAs on the VPU (MXU skipped,
    #      f32 throughout -- no amp/bf16 cast, so tie-breaks match reference).
    logit_rows = []
    for kk in range(k):
        r = jnp.full((1, t), b_ref[kk], dtype=jnp.float32)
        for cc in range(c_in):
            r = r + w_ref[kk, cc] * x[cc:cc + 1, :]
        logit_rows.append(r)

    # ---- argmax over classes (first-index tie break, like torch.argmax) ----
    best = logit_rows[0]
    idx = jnp.zeros((1, t), jnp.int32)
    for kk in range(1, k):
        better = logit_rows[kk] > best
        best = jnp.where(better, logit_rows[kk], best)
        idx = jnp.where(better, jnp.int32(kk), idx)

    lab = lab_ref[...]                               # (1, T) int32

    # ---- one-hot encode predictions and labels ----
    k_iota = lax.broadcasted_iota(jnp.int32, (k, t), 0)
    pred_oh = (k_iota == idx).astype(jnp.float32)    # (K, T)
    lab_oh = (k_iota == lab).astype(jnp.float32)     # (K, T)

    pred_ref[...] = pred_oh
    laboh_ref[...] = lab_oh

    # ---- Dice partial sums, accumulated across S tiles in VMEM scratch ----
    inter_sc[...] += jnp.sum(pred_oh * lab_oh, axis=1, keepdims=True)
    psum_sc[...] += jnp.sum(pred_oh, axis=1, keepdims=True)
    lsum_sc[...] += jnp.sum(lab_oh, axis=1, keepdims=True)

    @pl.when(si == n_s - 1)
    def _():
        # NOTE: includes background class (MONAI DiceMetric defaults to
        # include_background=False); eps keeps empty classes at 0 instead of NaN.
        dice_ref[...] = (2.0 * inter_sc[...]) / (
            psum_sc[...] + lsum_sc[...] + 1e-6
        )


def _pick_lane_tile(s, max_tile=2048):
    """Largest multiple of 128 that divides s and is <= max_tile."""
    assert s % 128 == 0, "flattened spatial size must be a multiple of 128"
    t = min(max_tile, s)
    t -= t % 128
    while s % t:
        t -= 128
    return t


@functools.partial(
    jax.jit, static_argnames=("crop", "overlap", "num_classes")
)
def inference_aug_test_forward(images, labels, w, b, *, crop, overlap,
                               num_classes):
    """images: (B, C_in, D, H, W) f32, labels: (B, 1, D, H, W) int32.

    `crop` / `overlap` are kept for interface fidelity with the reference
    sliding_window_inference; for a point-wise model with constant blending the
    result is independent of them (acc/cnt == per-voxel logits).
    """
    del crop, overlap
    # TODO(synk): MONAI "gaussian" blending mode not implemented; only the
    #             constant-blending (point-wise-model) equivalence is used.
    B, c_in, D, H, W = images.shape
    S = D * H * W
    K = num_classes
    tile = _pick_lane_tile(S)
    n_s = S // tile

    x = images.reshape(B, c_in, S)
    lab = labels.reshape(B, 1, S).astype(jnp.int32)

    pred_oh, lab_oh, dice = pl.pallas_call(
        _fused_infer_kernel,
        out_shape=(
            jax.ShapeDtypeStruct((B, K, S), jnp.float32),   # post_pred one-hot
            jax.ShapeDtypeStruct((B, K, S), jnp.float32),   # post_label one-hot
            jax.ShapeDtypeStruct((B, K, 1), jnp.float32),   # per-class dice
        ),
        grid_spec=pltpu.PrefetchScalarGridSpec(
            num_scalar_prefetch=0,
            grid=(B, n_s),
            in_specs=[
                pl.BlockSpec(memory_space=pltpu.MemorySpace.SMEM),   # w (K,C)
                pl.BlockSpec(memory_space=pltpu.MemorySpace.SMEM),   # b (K,)
                pl.BlockSpec((None, c_in, tile), lambda bi, si: (bi, 0, si)),
                pl.BlockSpec((None, 1, tile), lambda bi, si: (bi, 0, si)),
            ],
            out_specs=(
                pl.BlockSpec((None, K, tile), lambda bi, si: (bi, 0, si)),
                pl.BlockSpec((None, K, tile), lambda bi, si: (bi, 0, si)),
                pl.BlockSpec((None, K, 1), lambda bi, si: (bi, 0, 0)),
            ),
            scratch_shapes=[
                pltpu.VMEM((K, 1), jnp.float32),
                pltpu.VMEM((K, 1), jnp.float32),
                pltpu.VMEM((K, 1), jnp.float32),
            ],
        ),
        compiler_params=pltpu.CompilerParams(
            dimension_semantics=("parallel", "arbitrary"),
        ),
    )(w, b, x, lab)

    # TODO(synk): checkpoint loading (torch.load) and NIfTI writing (save_flag)
    #             have no Pallas equivalent.
    return (
        pred_oh.reshape(B, K, D, H, W),
        lab_oh.reshape(B, K, D, H, W),
        dice,
    )


if __name__ == "__main__":
    B, C_IN, K = 2, 4, 3          # to_onehot = 3 classes
    D = H = W = 16                # small validation volume
    CROP, OVERLAP = 8, 0.0        # crop_size_x/y/z, overlap

    key = jax.random.PRNGKey(0)
    k_img, k_lab, k_w, k_b = jax.random.split(key, 4)
    images = jax.random.normal(k_img, (B, C_IN, D, H, W), dtype=jnp.float32)
    labels = jax.random.randint(k_lab, (B, 1, D, H, W), 0, K, dtype=jnp.int32)
    # Deterministic synthetic model parameters (1x1x1 conv: C_in -> K classes).
    w = jax.random.normal(k_w, (K, C_IN), dtype=jnp.float32) * 0.5
    b = jax.random.normal(k_b, (K,), dtype=jnp.float32) * 0.1

    preds, labs, dices = inference_aug_test_forward(
        images, labels, w, b, crop=CROP, overlap=OVERLAP, num_classes=K
    )
    jax.block_until_ready((preds, labs, dices))

    assert preds.shape == (B, K, D, H, W)
    assert labs.shape == (B, K, D, H, W)
    assert dices.shape == (B, K, 1)
    # each voxel is one-hot
    assert bool(jnp.all(jnp.sum(preds, axis=1) == 1.0))
    assert bool(jnp.all(jnp.sum(labs, axis=1) == 1.0))

    # pure-JAX reference check
    S = D * H * W
    logits_ref = (
        jnp.einsum("kc,bcs->bks", w, images.reshape(B, C_IN, S))
        + b[None, :, None]
    )
    pred_oh_ref = jax.nn.one_hot(jnp.argmax(logits_ref, axis=1), K, axis=1)
    lab_oh_ref = jax.nn.one_hot(labels.reshape(B, S), K, axis=1)
    inter = jnp.sum(pred_oh_ref * lab_oh_ref, axis=2)
    dice_ref = (2.0 * inter) / (
        jnp.sum(pred_oh_ref, axis=2) + jnp.sum(lab_oh_ref, axis=2) + 1e-6
    )
    assert bool(jnp.all(labs.reshape(B, K, S) == lab_oh_ref))
    # tolerate rare argmax flips from differing f32 summation order
    mismatch = float(jnp.mean(jnp.abs(preds.reshape(B, K, S) - pred_oh_ref)))
    assert mismatch < 1e-2, mismatch
    assert bool(jnp.allclose(dices[..., 0], dice_ref, atol=1e-2))

    print("KERNEL_OK")
</pallas_src>

<mosaic_0001>
module attributes {stable_mosaic.version = 11 : i64} {
  func.func @_fused_infer_kernel(%arg0: i32, %arg1: i32, %arg2: memref<3x4xf32, #tpu.memory_space<smem>>, %arg3: memref<3xf32, #tpu.memory_space<smem>>, %arg4: memref<1x4x2048xf32, #tpu.memory_space<vmem>>, %arg5: memref<1x1x2048xi32, #tpu.memory_space<vmem>>, %arg6: memref<1x3x2048xf32, #tpu.memory_space<vmem>>, %arg7: memref<1x3x2048xf32, #tpu.memory_space<vmem>>, %arg8: memref<1x3x1xf32, #tpu.memory_space<vmem>>, %arg9: memref<3x1xf32, #tpu.memory_space<vmem>>, %arg10: memref<3x1xf32, #tpu.memory_space<vmem>>, %arg11: memref<3x1xf32, #tpu.memory_space<vmem>>) attributes {dimension_semantics = [#tpu.dimension_semantics<parallel>, #tpu.dimension_semantics<arbitrary>], iteration_bounds = array<i64: 2, 2>, scalar_prefetch = 0 : i64, scratch_operands = 3 : i64, tpu.core_type = #tpu.core_type<tc>, window_params = [{transform_indices = @transform_0, window_bounds = array<i64: 3, 4>}, {transform_indices = @transform_1, window_bounds = array<i64: 3>}, {transform_indices = @transform_2, window_bounds = array<i64: 1, 4, 2048>}, {transform_indices = @transform_3, window_bounds = array<i64: 1, 1, 2048>}, {transform_indices = @transform_4, window_bounds = array<i64: 1, 3, 2048>}, {transform_indices = @transform_5, window_bounds = array<i64: 1, 3, 2048>}, {transform_indices = @transform_6, window_bounds = array<i64: 1, 3, 1>}]} {
    %c0_i32 = arith.constant 0 : i32
    %0 = arith.cmpi eq, %arg1, %c0_i32 : i32
    %1 = arith.extui %0 : i1 to i32
    %c0_i32_0 = arith.constant 0 : i32
    %2 = arith.cmpi ne, %1, %c0_i32_0 : i32
    scf.if %2 {
      %cst_53 = arith.constant 0.000000e+00 : f32
      %115 = vector.broadcast %cst_53 : f32 to vector<3x1xf32>
      %c0_54 = arith.constant 0 : index
      %c0_55 = arith.constant 0 : index
      %116 = vector.load %arg9[%c0_54, %c0_55] : memref<3x1xf32, #tpu.memory_space<vmem>>, vector<3x1xf32>
      tpu.vector_store %arg9[%c0_54, %c0_55], %115 {strides = array<i32>} : memref<3x1xf32, #tpu.memory_space<vmem>>, vector<3x1xf32>,
      %cst_56 = arith.constant 0.000000e+00 : f32
      %117 = vector.broadcast %cst_56 : f32 to vector<3x1xf32>
      %c0_57 = arith.constant 0 : index
      %c0_58 = arith.constant 0 : index
      %118 = vector.load %arg10[%c0_57, %c0_58] : memref<3x1xf32, #tpu.memory_space<vmem>>, vector<3x1xf32>
      tpu.vector_store %arg10[%c0_57, %c0_58], %117 {strides = array<i32>} : memref<3x1xf32, #tpu.memory_space<vmem>>, vector<3x1xf32>,
      %cst_59 = arith.constant 0.000000e+00 : f32
      %119 = vector.broadcast %cst_59 : f32 to vector<3x1xf32>
      %c0_60 = arith.constant 0 : index
      %c0_61 = arith.constant 0 : index
      %120 = vector.load %arg11[%c0_60, %c0_61] : memref<3x1xf32, #tpu.memory_space<vmem>>, vector<3x1xf32>
      tpu.vector_store %arg11[%c0_60, %c0_61], %119 {strides = array<i32>} : memref<3x1xf32, #tpu.memory_space<vmem>>, vector<3x1xf32>,
    } else {
    }
    %c0 = arith.constant 0 : index
    %c0_1 = arith.constant 0 : index
    %c0_2 = arith.constant 0 : index
    %3 = vector.load %arg4[%c0, %c0_1, %c0_2] : memref<1x4x2048xf32, #tpu.memory_space<vmem>>, vector<1x4x2048xf32>
    %4 = vector.shape_cast %3 : vector<1x4x2048xf32> to vector<4x2048xf32>
    %c0_3 = arith.constant 0 : index
    %5 = memref.load %arg3[%c0_3] : memref<3xf32, #tpu.memory_space<smem>>
    %6 = vector.broadcast %5 : f32 to vector<1x2048xf32>
    %c0_4 = arith.constant 0 : index
    %c0_5 = arith.constant 0 : index
    %7 = memref.load %arg2[%c0_4, %c0_5] : memref<3x4xf32, #tpu.memory_space<smem>>
    %8 = vector.extract_strided_slice %4 {offsets = [0, 0], sizes = [1, 2048], strides = [1, 1]} : vector<4x2048xf32> to vector<1x2048xf32>
    %9 = vector.broadcast %7 : f32 to vector<1x2048xf32>
    %10 = arith.mulf %9, %8 : vector<1x2048xf32>
    %11 = arith.addf %6, %10 : vector<1x2048xf32>
    %c0_6 = arith.constant 0 : index
    %c1 = arith.constant 1 : index
    %12 = memref.load %arg2[%c0_6, %c1] : memref<3x4xf32, #tpu.memory_space<smem>>
    %13 = vector.extract_strided_slice %4 {offsets = [1, 0], sizes = [1, 2048], strides = [1, 1]} : vector<4x2048xf32> to vector<1x2048xf32>
    %14 = vector.broadcast %12 : f32 to vector<1x2048xf32>
    %15 = arith.mulf %14, %13 : vector<1x2048xf32>
    %16 = arith.addf %11, %15 : vector<1x2048xf32>
    %c0_7 = arith.constant 0 : index
    %c2 = arith.constant 2 : index
    %17 = memref.load %arg2[%c0_7, %c2] : memref<3x4xf32, #tpu.memory_space<smem>>
    %18 = vector.extract_strided_slice %4 {offsets = [2, 0], sizes = [1, 2048], strides = [1, 1]} : vector<4x2048xf32> to vector<1x2048xf32>
    %19 = vector.broadcast %17 : f32 to vector<1x2048xf32>
    %20 = arith.mulf %19, %18 : vector<1x2048xf32>
    %21 = arith.addf %16, %20 : vector<1x2048xf32>
    %c0_8 = arith.constant 0 : index
    %c3 = arith.constant 3 : index
    %22 = memref.load %arg2[%c0_8, %c3] : memref<3x4xf32, #tpu.memory_space<smem>>
    %23 = vector.extract_strided_slice %4 {offsets = [3, 0], sizes = [1, 2048], strides = [1, 1]} : vector<4x2048xf32> to vector<1x2048xf32>
    %24 = vector.broadcast %22 : f32 to vector<1x2048xf32>
    %25 = arith.mulf %24, %23 : vector<1x2048xf32>
    %26 = arith.addf %21, %25 : vector<1x2048xf32>
    %c1_9 = arith.constant 1 : index
    %27 = memref.load %arg3[%c1_9] : memref<3xf32, #tpu.memory_space<smem>>
    %28 = vector.broadcast %27 : f32 to vector<1x2048xf32>
    %c1_10 = arith.constant 1 : index
    %c0_11 = arith.constant 0 : index
    %29 = memref.load %arg2[%c1_10, %c0_11] : memref<3x4xf32, #tpu.memory_space<smem>>
    %30 = vector.extract_strided_slice %4 {offsets = [0, 0], sizes = [1, 2048], strides = [1, 1]} : vector<4x2048xf32> to vector<1x2048xf32>
    %31 = vector.broadcast %29 : f32 to vector<1x2048xf32>
    %32 = arith.mulf %31, %30 : vector<1x2048xf32>
    %33 = arith.addf %28, %32 : vector<1x2048xf32>
    %c1_12 = arith.constant 1 : index
    %c1_13 = arith.constant 1 : index
    %34 = memref.load %arg2[%c1_12, %c1_13] : memref<3x4xf32, #tpu.memory_space<smem>>
    %35 = vector.extract_strided_slice %4 {offsets = [1, 0], sizes = [1, 2048], strides = [1, 1]} : vector<4x2048xf32> to vector<1x2048xf32>
    %36 = vector.broadcast %34 : f32 to vector<1x2048xf32>
    %37 = arith.mulf %36, %35 : vector<1x2048xf32>
    %38 = arith.addf %33, %37 : vector<1x2048xf32>
    %c1_14 = arith.constant 1 : index
    %c2_15 = arith.constant 2 : index
    %39 = memref.load %arg2[%c1_14, %c2_15] : memref<3x4xf32, #tpu.memory_space<smem>>
    %40 = vector.extract_strided_slice %4 {offsets = [2, 0], sizes = [1, 2048], strides = [1, 1]} : vector<4x2048xf32> to vector<1x2048xf32>
    %41 = vector.broadcast %39 : f32 to vector<1x2048xf32>
    %42 = arith.mulf %41, %40 : vector<1x2048xf32>
    %43 = arith.addf %38, %42 : vector<1x2048xf32>
    %c1_16 = arith.constant 1 : index
    %c3_17 = arith.constant 3 : index
    %44 = memref.load %arg2[%c1_16, %c3_17] : memref<3x4xf32, #tpu.memory_space<smem>>
    %45 = vector.extract_strided_slice %4 {offsets = [3, 0], sizes = [1, 2048], strides = [1, 1]} : vector<4x2048xf32> to vector<1x2048xf32>
    %46 = vector.broadcast %44 : f32 to vector<1x2048xf32>
    %47 = arith.mulf %46, %45 : vector<1x2048xf32>
    %48 = arith.addf %43, %47 : vector<1x2048xf32>
    %c2_18 = arith.constant 2 : index
    %49 = memref.load %arg3[%c2_18] : memref<3xf32, #tpu.memory_space<smem>>
    %50 = vector.broadcast %49 : f32 to vector<1x2048xf32>
    %c2_19 = arith.constant 2 : index
    %c0_20 = arith.constant 0 : index
    %51 = memref.load %arg2[%c2_19, %c0_20] : memref<3x4xf32, #tpu.memory_space<smem>>
    %52 = vector.extract_strided_slice %4 {offsets = [0, 0], sizes = [1, 2048], strides = [1, 1]} : vector<4x2048xf32> to vector<1x2048xf32>
    %53 = vector.broadcast %51 : f32 to vector<1x2048xf32>
    %54 = arith.mulf %53, %52 : vector<1x2048xf32>
    %55 = arith.addf %50, %54 : vector<1x2048xf32>
    %c2_21 = arith.constant 2 : index
    %c1_22 = arith.constant 1 : index
    %56 = memref.load %arg2[%c2_21, %c1_22] : memref<3x4xf32, #tpu.memory_space<smem>>
    %57 = vector.extract_strided_slice %4 {offsets = [1, 0], sizes = [1, 2048], strides = [1, 1]} : vector<4x2048xf32> to vector<1x2048xf32>
    %58 = vector.broadcast %56 : f32 to vector<1x2048xf32>
    %59 = arith.mulf %58, %57 : vector<1x2048xf32>
    %60 = arith.addf %55, %59 : vector<1x2048xf32>
    %c2_23 = arith.constant 2 : index
    %c2_24 = arith.constant 2 : index
    %61 = memref.load %arg2[%c2_23, %c2_24] : memref<3x4xf32, #tpu.memory_space<smem>>
    %62 = vector.extract_strided_slice %4 {offsets = [2, 0], sizes = [1, 2048], strides = [1, 1]} : vector<4x2048xf32> to vector<1x2048xf32>
    %63 = vector.broadcast %61 : f32 to vector<1x2048xf32>
    %64 = arith.mulf %63, %62 : vector<1x2048xf32>
    %65 = arith.addf %60, %64 : vector<1x2048xf32>
    %c2_25 = arith.constant 2 : index
    %c3_26 = arith.constant 3 : index
    %66 = memref.load %arg2[%c2_25, %c3_26] : memref<3x4xf32, #tpu.memory_space<smem>>
    %67 = vector.extract_strided_slice %4 {offsets = [3, 0], sizes = [1, 2048], strides = [1, 1]} : vector<4x2048xf32> to vector<1x2048xf32>
    %68 = vector.broadcast %66 : f32 to vector<1x2048xf32>
    %69 = arith.mulf %68, %67 : vector<1x2048xf32>
    %70 = arith.addf %65, %69 : vector<1x2048xf32>
    %c0_i32_27 = arith.constant 0 : i32
    %71 = vector.broadcast %c0_i32_27 : i32 to vector<1x2048xi32>
    %72 = arith.cmpf ogt, %48, %26 : vector<1x2048xf32>
    %73 = arith.select %72, %48, %26 : vector<1x2048xi1>, vector<1x2048xf32>
    %c1_i32 = arith.constant 1 : i32
    %74 = vector.broadcast %c1_i32 : i32 to vector<1x2048xi32>
    %75 = arith.select %72, %74, %71 : vector<1x2048xi1>, vector<1x2048xi32>
    %76 = arith.cmpf ogt, %70, %73 : vector<1x2048xf32>
    %c2_i32 = arith.constant 2 : i32
    %77 = vector.broadcast %c2_i32 : i32 to vector<1x2048xi32>
    %78 = arith.select %76, %77, %75 : vector<1x2048xi1>, vector<1x2048xi32>
    %c0_28 = arith.constant 0 : index
    %c0_29 = arith.constant 0 : index
    %c0_30 = arith.constant 0 : index
    %79 = vector.load %arg5[%c0_28, %c0_29, %c0_30] : memref<1x1x2048xi32, #tpu.memory_space<vmem>>, vector<1x1x2048xi32>
    %80 = vector.shape_cast %79 : vector<1x1x2048xi32> to vector<1x2048xi32>
    %81 = tpu.iota {dimensions = array<i32: 0>} : vector<3x2048xi32>
    %82 = vector.broadcast %78 : vector<1x2048xi32> to vector<3x2048xi32>
    %83 = arith.cmpi eq, %81, %82 : vector<3x2048xi32>
    %84 = arith.extui %83 : vector<3x2048xi1> to vector<3x2048xi32>
    %85 = arith.sitofp %84 : vector<3x2048xi32> to vector<3x2048xf32>
    %86 = vector.broadcast %80 : vector<1x2048xi32> to vector<3x2048xi32>
    %87 = arith.cmpi eq, %81, %86 : vector<3x2048xi32>
    %88 = arith.extui %87 : vector<3x2048xi1> to vector<3x2048xi32>
    %89 = arith.sitofp %88 : vector<3x2048xi32> to vector<3x2048xf32>
    %c0_31 = arith.constant 0 : index
    %c0_32 = arith.constant 0 : index
    %c0_33 = arith.constant 0 : index
    %90 = vector.load %arg6[%c0_31, %c0_32, %c0_33] : memref<1x3x2048xf32, #tpu.memory_space<vmem>>, vector<1x3x2048xf32>
    %91 = vector.shape_cast %90 : vector<1x3x2048xf32> to vector<3x2048xf32>
    %92 = vector.shape_cast %85 : vector<3x2048xf32> to vector<1x3x2048xf32>
    tpu.vector_store %arg6[%c0_31, %c0_32, %c0_33], %92 {strides = array<i32>} : memref<1x3x2048xf32, #tpu.memory_space<vmem>>, vector<1x3x2048xf32>,
    %c0_34 = arith.constant 0 : index
    %c0_35 = arith.constant 0 : index
    %c0_36 = arith.constant 0 : index
    %93 = vector.load %arg7[%c0_34, %c0_35, %c0_36] : memref<1x3x2048xf32, #tpu.memory_space<vmem>>, vector<1x3x2048xf32>
    %94 = vector.shape_cast %93 : vector<1x3x2048xf32> to vector<3x2048xf32>
    %95 = vector.shape_cast %89 : vector<3x2048xf32> to vector<1x3x2048xf32>
    tpu.vector_store %arg7[%c0_34, %c0_35, %c0_36], %95 {strides = array<i32>} : memref<1x3x2048xf32, #tpu.memory_space<vmem>>, vector<1x3x2048xf32>,
    %c0_37 = arith.constant 0 : index
    %c0_38 = arith.constant 0 : index
    %96 = vector.load %arg9[%c0_37, %c0_38] : memref<3x1xf32, #tpu.memory_space<vmem>>, vector<3x1xf32>
    %97 = arith.mulf %85, %89 : vector<3x2048xf32>
    %cst = arith.constant dense<0.000000e+00> : vector<3xf32>
    %98 = vector.multi_reduction <add>, %97, %cst [1] : vector<3x2048xf32> to vector<3xf32>
    %99 = vector.shape_cast %98 : vector<3xf32> to vector<3x1xf32>
    %100 = arith.addf %96, %99 : vector<3x1xf32>
    %c0_39 = arith.constant 0 : index
    %c0_40 = arith.constant 0 : index
    %101 = vector.load %arg9[%c0_39, %c0_40] : memref<3x1xf32, #tpu.memory_space<vmem>>, vector<3x1xf32>
    tpu.vector_store %arg9[%c0_39, %c0_40], %100 {strides = array<i32>} : memref<3x1xf32, #tpu.memory_space<vmem>>, vector<3x1xf32>,
    %c0_41 = arith.constant 0 : index
    %c0_42 = arith.constant 0 : index
    %102 = vector.load %arg10[%c0_41, %c0_42] : memref<3x1xf32, #tpu.memory_space<vmem>>, vector<3x1xf32>
    %cst_43 = arith.constant dense<0.000000e+00> : vector<3xf32>
    %103 = vector.multi_reduction <add>, %85, %cst_43 [1] : vector<3x2048xf32> to vector<3xf32>
    %104 = vector.shape_cast %103 : vector<3xf32> to vector<3x1xf32>
    %105 = arith.addf %102, %104 : vector<3x1xf32>
    %c0_44 = arith.constant 0 : index
    %c0_45 = arith.constant 0 : index
    %106 = vector.load %arg10[%c0_44, %c0_45] : memref<3x1xf32, #tpu.memory_space<vmem>>, vector<3x1xf32>
    tpu.vector_store %arg10[%c0_44, %c0_45], %105 {strides = array<i32>} : memref<3x1xf32, #tpu.memory_space<vmem>>, vector<3x1xf32>,
    %c0_46 = arith.constant 0 : index
    %c0_47 = arith.constant 0 : index
    %107 = vector.load %arg11[%c0_46, %c0_47] : memref<3x1xf32, #tpu.memory_space<vmem>>, vector<3x1xf32>
    %cst_48 = arith.constant dense<0.000000e+00> : vector<3xf32>
    %108 = vector.multi_reduction <add>, %89, %cst_48 [1] : vector<3x2048xf32> to vector<3xf32>
    %109 = vector.shape_cast %108 : vector<3xf32> to vector<3x1xf32>
    %110 = arith.addf %107, %109 : vector<3x1xf32>
    %c0_49 = arith.constant 0 : index
    %c0_50 = arith.constant 0 : index
    %111 = vector.load %arg11[%c0_49, %c0_50] : memref<3x1xf32, #tpu.memory_space<vmem>>, vector<3x1xf32>
    tpu.vector_store %arg11[%c0_49, %c0_50], %110 {strides = array<i32>} : memref<3x1xf32, #tpu.memory_space<vmem>>, vector<3x1xf32>,
    %c1_i32_51 = arith.constant 1 : i32
    %112 = arith.cmpi eq, %arg1, %c1_i32_51 : i32
    %113 = arith.extui %112 : i1 to i32
    %c0_i32_52 = arith.constant 0 : i32
    %114 = arith.cmpi ne, %113, %c0_i32_52 : i32
    scf.if %114 {
      %c0_53 = arith.constant 0 : index
      %c0_54 = arith.constant 0 : index
      %115 = vector.load %arg9[%c0_53, %c0_54] : memref<3x1xf32, #tpu.memory_space<vmem>>, vector<3x1xf32>
      %cst_55 = arith.constant 2.000000e+00 : f32
      %116 = vector.broadcast %cst_55 : f32 to vector<3x1xf32>
      %117 = arith.mulf %116, %115 : vector<3x1xf32>
      %c0_56 = arith.constant 0 : index
      %c0_57 = arith.constant 0 : index
      %118 = vector.load %arg10[%c0_56, %c0_57] : memref<3x1xf32, #tpu.memory_space<vmem>>, vector<3x1xf32>
      %c0_58 = arith.constant 0 : index
      %c0_59 = arith.constant 0 : index
      %119 = vector.load %arg11[%c0_58, %c0_59] : memref<3x1xf32, #tpu.memory_space<vmem>>, vector<3x1xf32>
      %120 = arith.addf %118, %119 : vector<3x1xf32>
      %cst_60 = arith.constant 9.99999997E-7 : f32
      %121 = vector.broadcast %cst_60 : f32 to vector<3x1xf32>
      %122 = arith.addf %120, %121 : vector<3x1xf32>
      %123 = arith.divf %117, %122 : vector<3x1xf32>
      %c0_61 = arith.constant 0 : index
      %c0_62 = arith.constant 0 : index
      %c0_63 = arith.constant 0 : index
      %124 = vector.load %arg8[%c0_61, %c0_62, %c0_63] : memref<1x3x1xf32, #tpu.memory_space<vmem>>, vector<1x3x1xf32>
      %125 = vector.shape_cast %124 : vector<1x3x1xf32> to vector<3x1xf32>
      %126 = vector.shape_cast %123 : vector<3x1xf32> to vector<1x3x1xf32>
      tpu.vector_store %arg8[%c0_61, %c0_62, %c0_63], %126 {strides = array<i32>} : memref<1x3x1xf32, #tpu.memory_space<vmem>>, vector<1x3x1xf32>,
    } else {
    }
    return
  }
  func.func @transform_0(%arg0: i32, %arg1: i32) -> (i32, i32) {
    %c0_i32 = arith.constant 0 : i32
    %c0_i32_0 = arith.constant 0 : i32
    %c0_i32_1 = arith.constant 0 : i32
    return %c0_i32, %c0_i32_0 : i32, i32
  }
  func.func @transform_1(%arg0: i32, %arg1: i32) -> i32 {
    %c0_i32 = arith.constant 0 : i32
    %c0_i32_0 = arith.constant 0 : i32
    return %c0_i32 : i32
  }
  func.func @transform_2(%arg0: i32, %arg1: i32) -> (i32, i32, i32) {
    %c0_i32 = arith.constant 0 : i32
    %c0_i32_0 = arith.constant 0 : i32
    return %arg0, %c0_i32, %arg1 : i32, i32, i32
  }
  func.func @transform_3(%arg0: i32, %arg1: i32) -> (i32, i32, i32) {
    %c0_i32 = arith.constant 0 : i32
    %c0_i32_0 = arith.constant 0 : i32
    return %arg0, %c0_i32, %arg1 : i32, i32, i32
  }
  func.func @transform_4(%arg0: i32, %arg1: i32) -> (i32, i32, i32) {
    %c0_i32 = arith.constant 0 : i32
    %c0_i32_0 = arith.constant 0 : i32
    return %arg0, %c0_i32, %arg1 : i32, i32, i32
  }
  func.func @transform_5(%arg0: i32, %arg1: i32) -> (i32, i32, i32) {
    %c0_i32 = arith.constant 0 : i32
    %c0_i32_0 = arith.constant 0 : i32
    return %arg0, %c0_i32, %arg1 : i32, i32, i32
  }
  func.func @transform_6(%arg0: i32, %arg1: i32) -> (i32, i32, i32) {
    %c0_i32 = arith.constant 0 : i32
    %c0_i32_0 = arith.constant 0 : i32
    %c0_i32_1 = arith.constant 0 : i32
    return %arg0, %c0_i32, %c0_i32_0 : i32, i32, i32
  }
}

</mosaic_0001>

<bundles_post_ra>
// kernel: inference_aug_test_forward.1
= control target key start
LH: loop header
LB: loop body
LE: loop exit
PB: predicated region body
PF: predicated region fallthrough
CT: control target
= control target key end

     0   :  { %12 = vsyncpa [#allocation6], 0  ;;  %s2699_s0 = inlined_call_operand.vmem [shape: f32[3,4], index: 0, kind: input, shape index: {}]   ;;  %s2700_s1 = inlined_call_operand.vmem [shape: f32[3], index: 1, kind: input, shape index: {}]   ;;  %s2701_s2 = inlined_call_operand.vmem [shape: f32[2,4,4096], index: 2, kind: input, shape index: {}]   ;;  %s2702_s3 = inlined_call_operand.vmem [shape: s32[2,1,4096], index: 3, kind: input, shape index: {}]   ;;  %s2703_s4 = inlined_call_operand.vmem [shape: f32[2,3,4096], index: 4, kind: output, shape index: {0}]   ;;  %s2704_s5 = inlined_call_operand.vmem [shape: f32[2,3,4096], index: 5, kind: output, shape index: {1}]   ;;  %s2705_s6 = inlined_call_operand.vmem [shape: f32[2,3,1], index: 6, kind: output, shape index: {2}]  }
   0x1   :  { %13 = vsyncpa [#allocation8], 0  ;;  %s1882_s21 = smov 0   ;;  %s1884_s22 = smov 0  }
   0x2   :  { %s1886_s23 = smov 0   ;;  %s1888_s24 = smov 0  }
   0x3   :  { %s1890_s25 = smov 0  }
   0x4 LB: > { %s1556_s26 = sadd.s32 4294967295, %s1840_s25   ;;  %s28_s27 = sadd.s32 1, %s1832_s23  ;;  %s1840_s25 = sphi %s1890_s25, %s19_s25   ;;  %s1836_s24 = sphi %s1888_s24, %s2727_s24   ;;  %s1832_s23 = sphi %s1886_s23, %s2726_s23   ;;  %s1828_s22 = sphi %s1884_s22, %s2725_s22   ;;  %s1824_s21 = sphi %s1882_s21, %s2724_s21  }
   0x5   : > { %p29_p0 = scmp.ge.s32.totalorder %s28_s27, 2  ;;  %s31_s28 = sadd.s32 1, %s1836_s24 }
   0x6   : > { %p1558_p1 = scmp.ge.s32.totalorder %s1840_s25, 1  ;;  %p216_p2 = scmp.lt.s32.totalorder %s1840_s25, 5 }
   0x7   : > { %s2729_s27 = smov (%p29_p0, %s28_s27), 0  ;;  %s2731_s28 = smov (!%p29_p0, %s31_s28), %s1836_s24 }
   0x8   : > { %p1915_p3 = pnand %p1558_p1, %p216_p2  ;;  %p33_p4 = scmp.ge.s32.totalorder %s2731_s28, 2 }
   0x9   : > { %p1919_p5 = scmp.eq.s32.totalorder %s1556_s26, 0  ;;  %s228_s9 = sshll.u32 %s2699_s0, 4  ;;  %s229_s9 = int_to_ptr.vmem [resolvable:$true] %s228_s9 }
   0xa   : > { %p1706_p6 = pneg %p1915_p3  ;;  %s2733_s28 = smov (%p33_p4, %s2731_s28), 0 }
   0xb   : > { %s238_s12 = sshll.u32 %s2700_s1, 4  ;;  %s1842_s13 = smov [#allocation5]   ;;  %s239_s12 = int_to_ptr.vmem [resolvable:$true] %s238_s12 }
   0xc   : > { %p1707_p7 = pnand %p1919_p5, %p1706_p6  ;;  %s1843_s14 = smov [#allocation7]  }
   0xd   : > { %276 = sbr.rel (%p1915_p3) target bundleno = 343 (0x157), region = 36 }
   0xe   : > { %1709 = dma.vmem_to_smem (!%p1707_p7), %s229_s9, 64, %s1842_s13, [#allocation6]  }
   0xf   : > { %1712 = dma.vmem_to_smem (!%p1707_p7), %s239_s12, 16, %s1843_s14, [#allocation8]  }
  0x12   : > { %1815 = dma.done.wait (%p1919_p5), [#allocation6], 64  }
  0x13   : > { %1817 = vsyncadd (%p1919_p5), [#allocation6], 4294967232 }
  0x14   : > { %1819 = dma.done.wait (%p1919_p5), [#allocation8], 16  }
  0x15   : > { %1821 = vsyncadd (%p1919_p5), [#allocation8], 4294967280 }
  0x16   : > { %288 = sfence }
  0x17   : > { %s1565_s15 = sshll.u32 %s1824_s21, 4  ;;  %p343_p8 = scmp.lt.s32.totalorder %s1828_s22, 1 }
  0x18   : > { %p345_p9 = scmp.lt.s32.totalorder %s1565_s15, 31  ;;  %p1577_p10 = scmp.ne.s32.totalorder %s1824_s21, 0 }
  0x19   : > { %s2735_s22 = smov (!%p343_p8, %s1828_s22), 1 }
  0x1a   : > { %s2737_s15 = smov (!%p345_p9, %s1565_s15), 31  ;;  %s1566_s16 = sshll.u32 %s2735_s22, 5 }
  0x1b   : > { %s1576_s17 = sshll.u32 %s2735_s22, 2  ;;  %s348_s18 = sadd.s32 %s1566_s16, %s2737_s15 }
  0x1c   : > { %s1951_s26 = scalar_lea.vmem %s2705_s6, %s1576_s17  ;;  %s1567_s29 = sshll.u32 %s348_s18, 2 }
  0x1d   : > { %s1956_s8 = scalar_lea.vmem %s2702_s3, %s348_s18  ;;  %s350_s11 = scalar_lea.vmem %s2701_s2, %s1567_s29 }
  0x1e   : > { %s1964_s22 = scalar_lea.vmem %s2703_s4, %s1567_s29  ;;  %s1969_s16 = scalar_lea.vmem %s2704_s5, %s1567_s29 }
  0x1f   : > { %388 = sbr.rel (%p1577_p10) target bundleno = 40 (0x28), region = 48 }
  0x24   : > { %vm389_vm0 = vcmask 2048   ;;  %v1844_v0 = vmov 0.0  }
  0x25   : > { %390 = vst.msk [vmem:[#allocation2] sm:$0x7] %vm389_vm0, %v1844_v0 }
  0x26   : > { %391 = vst.msk [vmem:[#allocation3] sm:$0x7] %vm389_vm0, %v1844_v0 }
  0x27   : > { %392 = vst.msk [vmem:[#allocation4] sm:$0x7] %vm389_vm0, %v1844_v0 }
  0x28 PF: > { %s403_s17 = sld [smem:[#allocation5]]  ;;  %v1972_v1 = vld [vmem:[%s350_s11] sm:$0xff]  ;;  %v1974_v2 = vld [vmem:[%s350_s11 + $0x8] sm:$0xff]  ;;  %v1976_v4 = vld [vmem:[%s350_s11 + $0x10] sm:$0xff]  ;;  %p1695_p11 = scmp.ne.s32.totalorder %s1824_s21, 1 }
  0x29   : > { %s1578_s18 = sld [smem:[#allocation5 + $0x1]]  ;;  %v1978_v5 = vld [vmem:[%s350_s11 + $0x18] sm:$0xff]  ;;  %v1980_v6 = vld [vmem:[%s350_s11 + $0x20] sm:$0xff]  ;;  %v1982_v7 = vld [vmem:[%s350_s11 + $0x28] sm:$0xff] }
  0x2a   : > { %s401_s19 = sld [smem:[#allocation7]]  ;;  %v1988_v11 = vld [vmem:[%s350_s11 + $0x30] sm:$0xff]  ;;  %v1990_v12 = vld [vmem:[%s350_s11 + $0x38] sm:$0xff] }
  0x2b   : > { %s1587_s20 = sld [smem:[#allocation5 + $0x2]] }
  0x2c   : > { %s1986_s29 = sld [smem:[#allocation5 + $0x3]] }
  0x2d   : > { %s2015_s30 = sld [smem:[#allocation7 + $0x1]] }
  0x2e   : > { %v404_v3 = vstv %s403_s17  ;;  %s2017_s7 = sld [smem:[#allocation5 + $0x80]] }
  0x2f   : > { %v405_v8 = vmul.f32 %v404_v3, %v1972_v1  ;;  %v406_v9 = vmul.f32 %v404_v3, %v1974_v2  ;;  %v422_v10 = vstv %s1578_s18  ;;  %v407_v14 = vmul.f32 %v404_v3, %v1976_v4  ;;  %s2019_s9 = sld [smem:[#allocation5 + $0x81]] }
  0x30   : > { %v402_v13 = vstv %s401_s19  ;;  %v408_v15 = vmul.f32 %v404_v3, %v1978_v5  ;;  %v409_v16 = vmul.f32 %v404_v3, %v1980_v6  ;;  %v410_v17 = vmul.f32 %v404_v3, %v1982_v7  ;;  %s2025_s10 = sld [smem:[#allocation5 + $0x82]] }
  0x31   : > { %v423_v18 = vmul.f32 %v422_v10, %v1972_v1  ;;  %v424_v19 = vmul.f32 %v422_v10, %v1974_v2  ;;  %v425_v20 = vmul.f32 %v422_v10, %v1976_v4  ;;  %v426_v21 = vmul.f32 %v422_v10, %v1978_v5  ;;  %s2030_s11 = sld [smem:[#allocation5 + $0x83]] }
  0x32   : > { %v411_v22 = vmul.f32 %v404_v3, %v1988_v11  ;;  %v412_v23 = vmul.f32 %v404_v3, %v1990_v12  ;;  %v413_v24 = vadd.f32 %v405_v8, %v402_v13  ;;  %v414_v25 = vadd.f32 %v406_v9, %v402_v13  ;;  %s2092_s12 = sld [smem:[#allocation5 + $0x100]] }
  0x33   : > { %v415_v26 = vadd.f32 %v407_v14, %v402_v13  ;;  %v416_v27 = vadd.f32 %v408_v15, %v402_v13  ;;  %v417_v28 = vadd.f32 %v409_v16, %v402_v13  ;;  %v427_v29 = vmul.f32 %v422_v10, %v1980_v6  ;;  %s2102_s13 = sld [smem:[#allocation5 + $0x101]] }
  0x34   : > { %v428_v30 = vmul.f32 %v422_v10, %v1982_v7  ;;  %v429_v31 = vmul.f32 %v422_v10, %v1988_v11  ;;  %v430_v32 = vmul.f32 %v422_v10, %v1990_v12  ;;  %v472_v33 = vstv %s1587_s20  ;;  %s1634_s14 = sld [smem:[#allocation7 + $0x2]] }
  0x35   : > { %v1579_v34 = vrot.slane %v423_v18, 9  ;;  %v1580_v35 = vrot.slane %v424_v19, 9  ;;  %v1581_v36 = vrot.slane %v425_v20, 9  ;;  %v1582_v37 = vrot.slane %v426_v21, 9  ;;  %s2114_s15 = sld [smem:[#allocation5 + $0x102]] }
  0x36   : > { %v418_v38 = vadd.f32 %v410_v17, %v402_v13  ;;  %v419_v39 = vadd.f32 %v411_v22, %v402_v13  ;;  %v420_v40 = vadd.f32 %v412_v23, %v402_v13  ;;  %v522_v41 = vstv %s1986_s29  ;;  %s2167_s17 = sld [smem:[#allocation5 + $0x103]] }
  0x37   : > { %v1583_v42 = vrot.slane %v427_v29, 9  ;;  %v473_v43 = vmul.f32 %v472_v33, %v1972_v1  ;;  %v474_v44 = vmul.f32 %v472_v33, %v1974_v2  ;;  %v475_v45 = vmul.f32 %v472_v33, %v1976_v4 }
  0x38   : > { %v1584_v46 = vrot.slane %v428_v30, 9  ;;  %v1585_v47 = vrot.slane %v429_v31, 9  ;;  %v1586_v48 = vrot.slane %v430_v32, 9  ;;  %v476_v49 = vmul.f32 %v472_v33, %v1978_v5 }
  0x39   : > { %v463_v50 = vadd.f32 %v1579_v34, %v413_v24  ;;  %v464_v51 = vadd.f32 %v1580_v35, %v414_v25  ;;  %v465_v52 = vadd.f32 %v1581_v36, %v415_v26  ;;  %v466_v53 = vadd.f32 %v1582_v37, %v416_v27 }
  0x3a   : > { %v477_v54 = vmul.f32 %v472_v33, %v1980_v6  ;;  %v478_v55 = vmul.f32 %v472_v33, %v1982_v7  ;;  %v479_v56 = vmul.f32 %v472_v33, %v1988_v11  ;;  %v480_v57 = vmul.f32 %v472_v33, %v1990_v12 }
  0x3b   : > { %v467_v58 = vadd.f32 %v1583_v42, %v417_v28  ;;  %v1588_v59 = vrot.slane %v473_v43, 10  ;;  %v1589_v60 = vrot.slane %v474_v44, 10  ;;  %v1590_v61 = vrot.slane %v475_v45, 10 }
  0x3c   : > { %v468_v62 = vadd.f32 %v1584_v46, %v418_v38  ;;  %v469_v63 = vadd.f32 %v1585_v47, %v419_v39  ;;  %v470_v0 = vadd.f32 %v1586_v48, %v420_v40  ;;  %v1591_v3 = vrot.slane %v476_v49, 10 }
  0x3d   : > { %v523_v8 = vmul.f32 %v522_v41, %v1972_v1  ;;  %v524_v9 = vmul.f32 %v522_v41, %v1974_v2  ;;  %v525_v10 = vmul.f32 %v522_v41, %v1976_v4  ;;  %v526_v13 = vmul.f32 %v522_v41, %v1978_v5 }
  0x3e   : > { %v1592_v14 = vrot.slane %v477_v54, 10  ;;  %v1593_v15 = vrot.slane %v478_v55, 10  ;;  %v1594_v16 = vrot.slane %v479_v56, 10  ;;  %v1595_v17 = vrot.slane %v480_v57, 10 }
  0x3f   : > { %v513_v18 = vadd.f32 %v1588_v59, %v463_v50  ;;  %v514_v19 = vadd.f32 %v1589_v60, %v464_v51  ;;  %v515_v20 = vadd.f32 %v1590_v61, %v465_v52  ;;  %v2028_v21 = vmul.f32 %v522_v41, %v1980_v6 }
  0x40   : > { %v516_v22 = vadd.f32 %v1591_v3, %v466_v53  ;;  %v2033_v23 = vmul.f32 %v522_v41, %v1982_v7  ;;  %v2036_v24 = vmul.f32 %v522_v41, %v1988_v11  ;;  %v2039_v25 = vmul.f32 %v522_v41, %v1990_v12 }
  0x41   : > { %v1597_v26 = vrot.slane %v523_v8, 11  ;;  %v1598_v27 = vrot.slane %v524_v9, 11  ;;  %v1599_v28 = vrot.slane %v525_v10, 11  ;;  %v1600_v29 = vrot.slane %v526_v13, 11 }
  0x42   : > { %v2041_v30 = vadd.f32 %v1592_v14, %v467_v58  ;;  %v2043_v31 = vadd.f32 %v1593_v15, %v468_v62  ;;  %v572_v32 = vstv %s2015_s30  ;;  %v2046_v33 = vadd.f32 %v1594_v16, %v469_v63 }
  0x43   : > { %v2048_v34 = vadd.f32 %v1595_v17, %v470_v0  ;;  %v1601_v35 = vrot.slane %v2028_v21, 11  ;;  %v574_v36 = vstv %s2017_s7  ;;  %v1602_v37 = vrot.slane %v2033_v23, 11 }
  0x44   : > { %v1603_v38 = vrot.slane %v2036_v24, 11  ;;  %v1604_v39 = vrot.slane %v2039_v25, 11  ;;  %v592_v40 = vstv %s2019_s9  ;;  %v2056_v41 = vadd.f32 %v1597_v26, %v513_v18 }
  0x45   : > { %v2058_v42 = vadd.f32 %v1598_v27, %v514_v19  ;;  %v2060_v43 = vadd.f32 %v1599_v28, %v515_v20  ;;  %v2062_v44 = vadd.f32 %v1600_v29, %v516_v22  ;;  %v575_v45 = vmul.f32 %v574_v36, %v1972_v1 }
  0x46   : > { %v576_v46 = vmul.f32 %v574_v36, %v1974_v2  ;;  %v577_v47 = vmul.f32 %v574_v36, %v1976_v4  ;;  %v642_v48 = vstv %s2025_s10  ;;  %v578_v49 = vmul.f32 %v574_v36, %v1978_v5 }
  0x47   : > { %v579_v50 = vmul.f32 %v574_v36, %v1980_v6  ;;  %v593_v51 = vmul.f32 %v592_v40, %v1972_v1  ;;  %v2072_v52 = vstv %s2030_s11  ;;  %v580_v53 = vmul.f32 %v574_v36, %v1982_v7 }
  0x48   : > { %v594_v54 = vmul.f32 %v592_v40, %v1974_v2  ;;  %v595_v55 = vmul.f32 %v592_v40, %v1976_v4  ;;  %v596_v56 = vmul.f32 %v592_v40, %v1978_v5  ;;  %v581_v57 = vmul.f32 %v574_v36, %v1988_v11 }
  0x49   : > { %v597_v58 = vmul.f32 %v592_v40, %v1980_v6  ;;  %v598_v59 = vmul.f32 %v592_v40, %v1982_v7  ;;  %v599_v60 = vmul.f32 %v592_v40, %v1988_v11  ;;  %v582_v61 = vmul.f32 %v574_v36, %v1990_v12 }
  0x4a   : > { %v583_v62 = vadd.f32 %v575_v45, %v572_v32  ;;  %v584_v63 = vadd.f32 %v576_v46, %v572_v32  ;;  %v585_v0 = vadd.f32 %v577_v47, %v572_v32  ;;  %v586_v3 = vadd.f32 %v578_v49, %v572_v32 }
  0x4b   : > { %v587_v8 = vadd.f32 %v579_v50, %v572_v32  ;;  %v600_v9 = vmul.f32 %v592_v40, %v1990_v12  ;;  %v1608_v10 = vrot.slane %v593_v51, 9  ;;  %v588_v13 = vadd.f32 %v580_v53, %v572_v32 }
  0x4c   : > { %v1609_v14 = vrot.slane %v594_v54, 9  ;;  %v1610_v15 = vrot.slane %v595_v55, 9  ;;  %v1611_v16 = vrot.slane %v596_v56, 9  ;;  %v589_v17 = vadd.f32 %v581_v57, %v572_v32 }
  0x4d   : > { %v1612_v18 = vrot.slane %v597_v58, 9  ;;  %v1613_v19 = vrot.slane %v598_v59, 9  ;;  %v1614_v20 = vrot.slane %v599_v60, 9  ;;  %v590_v22 = vadd.f32 %v582_v61, %v572_v32 }
  0x4e   : > { %v643_v26 = vmul.f32 %v642_v48, %v1972_v1  ;;  %v644_v27 = vmul.f32 %v642_v48, %v1974_v2  ;;  %v645_v28 = vmul.f32 %v642_v48, %v1976_v4  ;;  %v1615_v29 = vrot.slane %v600_v9, 9 }
  0x4f   : > { %v633_v36 = vadd.f32 %v1608_v10, %v583_v62  ;;  %v646_v40 = vmul.f32 %v642_v48, %v1978_v5  ;;  %v647_v45 = vmul.f32 %v642_v48, %v1980_v6  ;;  %v634_v46 = vadd.f32 %v1609_v14, %v584_v63 }
  0x50   : > { %v635_v47 = vadd.f32 %v1610_v15, %v585_v0  ;;  %v636_v49 = vadd.f32 %v1611_v16, %v586_v3  ;;  %v648_v50 = vmul.f32 %v642_v48, %v1982_v7  ;;  %v637_v51 = vadd.f32 %v1612_v18, %v587_v8 }
  0x51   : > { %v638_v53 = vadd.f32 %v1613_v19, %v588_v13  ;;  %v639_v32 = vadd.f32 %v1614_v20, %v589_v17  ;;  %v649_v54 = vmul.f32 %v642_v48, %v1988_v11  ;;  %v650_v55 = vmul.f32 %v642_v48, %v1990_v12 }
  0x52   : > { %v1617_v56 = vrot.slane %v643_v26, 10  ;;  %v1618_v57 = vrot.slane %v644_v27, 10  ;;  %v1619_v58 = vrot.slane %v645_v28, 10  ;;  %v640_v59 = vadd.f32 %v1615_v29, %v590_v22 }
  0x53   : > { %v1620_v60 = vrot.slane %v646_v40, 10  ;;  %v1621_v61 = vrot.slane %v647_v45, 10  ;;  %v693_v62 = vmul.f32 %v2072_v52, %v1972_v1  ;;  %v1622_v63 = vrot.slane %v648_v50, 10 }
  0x54   : > { %v694_v0 = vmul.f32 %v2072_v52, %v1974_v2  ;;  %v695_v3 = vmul.f32 %v2072_v52, %v1976_v4  ;;  %v696_v48 = vmul.f32 %v2072_v52, %v1978_v5  ;;  %v1623_v8 = vrot.slane %v649_v54, 10 }
  0x55   : > { %v697_v9 = vmul.f32 %v2072_v52, %v1980_v6  ;;  %v698_v10 = vmul.f32 %v2072_v52, %v1982_v7  ;;  %v699_v13 = vmul.f32 %v2072_v52, %v1988_v11  ;;  %v1624_v14 = vrot.slane %v650_v55, 10 }
  0x56   : > { %v683_v15 = vadd.f32 %v1617_v56, %v633_v36  ;;  %v684_v16 = vadd.f32 %v1618_v57, %v634_v46  ;;  %v685_v17 = vadd.f32 %v1619_v58, %v635_v47  ;;  %v686_v18 = vadd.f32 %v1620_v60, %v636_v49 }
  0x57   : > { %v687_v19 = vadd.f32 %v1621_v61, %v637_v51  ;;  %v2112_v20 = vmul.f32 %v2072_v52, %v1990_v12  ;;  %v1626_v22 = vrot.slane %v693_v62, 11  ;;  %v688_v26 = vadd.f32 %v1622_v63, %v638_v53 }
  0x58   : > { %v1627_v27 = vrot.slane %v694_v0, 11  ;;  %v1628_v28 = vrot.slane %v695_v3, 11  ;;  %v1629_v29 = vrot.slane %v696_v48, 11  ;;  %v689_v40 = vadd.f32 %v1623_v8, %v639_v32 }
  0x59   : > { %v1630_v36 = vrot.slane %v697_v9, 11  ;;  %v1631_v45 = vrot.slane %v698_v10, 11  ;;  %v1632_v46 = vrot.slane %v699_v13, 11  ;;  %v2119_v47 = vadd.f32 %v1601_v35, %v2041_v30 }
  0x5a   : > { %v2124_v52 = vadd.f32 %v1602_v37, %v2043_v31  ;;  %v2129_v49 = vadd.f32 %v1603_v38, %v2046_v33  ;;  %v744_v50 = vstv %s2092_s12  ;;  %v2135_v51 = vadd.f32 %v1604_v39, %v2048_v34 }
  0x5b   : > { %v2137_v53 = vadd.f32 %v1624_v14, %v640_v59  ;;  %v1633_v21 = vrot.slane %v2112_v20, 11  ;;  %v2140_v30 = vadd.f32 %v1626_v22, %v683_v15  ;;  %v2142_v23 = vadd.f32 %v1627_v27, %v684_v16 }
  0x5c   : > { %v2144_v31 = vadd.f32 %v1628_v28, %v685_v17  ;;  %v2146_v24 = vadd.f32 %v1629_v29, %v686_v18  ;;  %v762_v33 = vstv %s2102_s13  ;;  %v2149_v35 = vadd.f32 %v1630_v36, %v687_v19 }
  0x5d   : > { %v2151_v37 = vadd.f32 %v1631_v45, %v688_v26  ;;  %v2153_v25 = vadd.f32 %v1632_v46, %v689_v40  ;;  %v745_v34 = vmul.f32 %v744_v50, %v1972_v1  ;;  %v742_v38 = vstv %s1634_s14 }
  0x5e   : > { %v746_v39 = vmul.f32 %v744_v50, %v1974_v2  ;;  %v747_v32 = vmul.f32 %v744_v50, %v1976_v4  ;;  %v748_v54 = vmul.f32 %v744_v50, %v1978_v5  ;;  %v763_v55 = vmul.f32 %v762_v33, %v1972_v1 }
  0x5f   : > { %v764_v56 = vmul.f32 %v762_v33, %v1974_v2  ;;  %v765_v57 = vmul.f32 %v762_v33, %v1976_v4  ;;  %v812_v58 = vstv %s2114_s15  ;;  %v749_v59 = vmul.f32 %v744_v50, %v1980_v6 }
  0x60   : > { %v750_v60 = vmul.f32 %v744_v50, %v1982_v7  ;;  %v766_v61 = vmul.f32 %v762_v33, %v1978_v5  ;;  %v767_v62 = vmul.f32 %v762_v33, %v1980_v6  ;;  %v751_v63 = vmul.f32 %v744_v50, %v1988_v11 }
  0x61   : > { %v752_v0 = vmul.f32 %v744_v50, %v1990_v12  ;;  %v753_v3 = vadd.f32 %v745_v34, %v742_v38  ;;  %v768_v48 = vmul.f32 %v762_v33, %v1982_v7  ;;  %v754_v8 = vadd.f32 %v746_v39, %v742_v38 }
  0x62   : > { %v755_v9 = vadd.f32 %v747_v32, %v742_v38  ;;  %v756_v10 = vadd.f32 %v748_v54, %v742_v38  ;;  %v769_v13 = vmul.f32 %v762_v33, %v1988_v11  ;;  %v770_v14 = vmul.f32 %v762_v33, %v1990_v12 }
  0x63   : > { %v1637_v15 = vrot.slane %v763_v55, 9  ;;  %v1638_v16 = vrot.slane %v764_v56, 9  ;;  %v1639_v17 = vrot.slane %v765_v57, 9  ;;  %v757_v18 = vadd.f32 %v749_v59, %v742_v38 }
  0x64   : > { %v758_v19 = vadd.f32 %v750_v60, %v742_v38  ;;  %v1640_v22 = vrot.slane %v766_v61, 9  ;;  %v1641_v26 = vrot.slane %v767_v62, 9  ;;  %v759_v27 = vadd.f32 %v751_v63, %v742_v38 }
  0x65   : > { %v760_v28 = vadd.f32 %v752_v0, %v742_v38  ;;  %v1642_v29 = vrot.slane %v768_v48, 9  ;;  %v813_v40 = vmul.f32 %v812_v58, %v1972_v1  ;;  %v1643_v36 = vrot.slane %v769_v13, 9 }
  0x66   : > { %v814_v45 = vmul.f32 %v812_v58, %v1974_v2  ;;  %v815_v46 = vmul.f32 %v812_v58, %v1976_v4  ;;  %v816_v50 = vmul.f32 %v812_v58, %v1978_v5  ;;  %v1644_v33 = vrot.slane %v770_v14, 9 }
  0x67   : > { %v803_v34 = vadd.f32 %v1637_v15, %v753_v3  ;;  %v804_v39 = vadd.f32 %v1638_v16, %v754_v8  ;;  %v805_v32 = vadd.f32 %v1639_v17, %v755_v9  ;;  %v806_v54 = vadd.f32 %v1640_v22, %v756_v10 }
  0x68   : > { %v807_v55 = vadd.f32 %v1641_v26, %v757_v18  ;;  %v817_v56 = vmul.f32 %v812_v58, %v1980_v6  ;;  %v862_v57 = vstv %s2167_s17  ;;  %v818_v38 = vmul.f32 %v812_v58, %v1982_v7 }
  0x69   : > { %v819_v59 = vmul.f32 %v812_v58, %v1988_v11  ;;  %v820_v60 = vmul.f32 %v812_v58, %v1990_v12  ;;  %v1646_v61 = vrot.slane %v813_v40, 10  ;;  %v808_v62 = vadd.f32 %v1642_v29, %v758_v19 }
  0x6a   : > { %v1647_v63 = vrot.slane %v814_v45, 10  ;;  %v1648_v0 = vrot.slane %v815_v46, 10  ;;  %v1649_v48 = vrot.slane %v816_v50, 10  ;;  %v809_v13 = vadd.f32 %v1643_v36, %v759_v27 }
  0x6b   : > { %v810_v3 = vadd.f32 %v1644_v33, %v760_v28  ;;  %v863_v8 = vmul.f32 %v862_v57, %v1972_v1  ;;  %v864_v9 = vmul.f32 %v862_v57, %v1974_v2  ;;  %v1650_v10 = vrot.slane %v817_v56, 10 }
  0x6c   : > { %v865_v14 = vmul.f32 %v862_v57, %v1976_v4  ;;  %v866_v15 = vmul.f32 %v862_v57, %v1978_v5  ;;  %v867_v16 = vmul.f32 %v862_v57, %v1980_v6  ;;  %v1651_v17 = vrot.slane %v818_v38, 10 }
  0x6d   : > { %v1652_v58 = vrot.slane %v819_v59, 10  ;;  %v1653_v18 = vrot.slane %v820_v60, 10  ;;  %v853_v19 = vadd.f32 %v1646_v61, %v803_v34  ;;  %v854_v22 = vadd.f32 %v1647_v63, %v804_v39 }
  0x6e   : > { %v855_v26 = vadd.f32 %v1648_v0, %v805_v32  ;;  %v856_v29 = vadd.f32 %v1649_v48, %v806_v54  ;;  %v868_v27 = vmul.f32 %v862_v57, %v1982_v7  ;;  %v869_v1 = vmul.f32 %v862_v57, %v1988_v11 }
  0x6f   : > { %v870_v2 = vmul.f32 %v862_v57, %v1990_v12  ;;  %v1655_v28 = vrot.slane %v863_v8, 11  ;;  %v1656_v40 = vrot.slane %v864_v9, 11  ;;  %v857_v4 = vadd.f32 %v1650_v10, %v807_v55 }
  0x70   : > { %v1657_v36 = vrot.slane %v865_v14, 11  ;;  %v1658_v5 = vrot.slane %v866_v15, 11  ;;  %v1659_v45 = vrot.slane %v867_v16, 11  ;;  %v740_v6 = vadd.f32 %v1633_v21, %v2137_v53 }
  0x71   : > { %v858_v46 = vadd.f32 %v1651_v17, %v808_v62  ;;  %v859_v50 = vadd.f32 %v1652_v58, %v809_v13  ;;  %v860_v33 = vadd.f32 %v1653_v18, %v810_v3  ;;  %v1660_v34 = vrot.slane %v868_v27, 11 }
  0x72   : > { %vm911_vm1 = vcmp.gt.f32.partialorder %v2140_v30, %v2056_v41  ;;  %vm912_vm2 = vcmp.gt.f32.partialorder %v2142_v23, %v2058_v42  ;;  %vm913_vm3 = vcmp.gt.f32.partialorder %v2144_v31, %v2060_v43  ;;  %v1661_v7 = vrot.slane %v869_v1, 11 }
  0x73   : > { %v1662_v11 = vrot.slane %v870_v2, 11  ;;  %v903_v12 = vadd.f32 %v1655_v28, %v853_v19  ;;  %v904_v39 = vadd.f32 %v1656_v40, %v854_v22  ;;  %v905_v32 = vadd.f32 %v1657_v36, %v855_v26 }
  0x74   : > { %v906_v20 = vadd.f32 %v1658_v5, %v856_v29  ;;  %v907_v53 = vadd.f32 %v1659_v45, %v857_v4  ;;  %vm914_vm4 = vcmp.gt.f32.partialorder %v2146_v24, %v2062_v44  ;;  %vm915_vm5 = vcmp.gt.f32.partialorder %v2149_v35, %v2119_v47 }
  0x75   : > { %vm916_vm6 = vcmp.gt.f32.partialorder %v2151_v37, %v2124_v52  ;;  %vm917_vm7 = vcmp.gt.f32.partialorder %v2153_v25, %v2129_v49  ;;  %vm918_vm8 = vcmp.gt.f32.partialorder %v740_v6, %v2135_v51  ;;  %v908_v21 = vadd.f32 %v1660_v34, %v858_v46 }
  0x76   : > { %v919_v54 = vsel %vm911_vm1, %v2140_v30, %v2056_v41  ;;  %v920_v55 = vsel %vm912_vm2, %v2142_v23, %v2058_v42  ;;  %v909_v56 = vadd.f32 %v1661_v7, %v859_v50  ;;  %v910_v57 = vadd.f32 %v1662_v11, %v860_v33 }
  0x77   : > { %v921_v38 = vsel %vm913_vm3, %v2144_v31, %v2060_v43  ;;  %v922_v59 = vsel %vm914_vm4, %v2146_v24, %v2062_v44  ;;  %v923_v60 = vsel %vm915_vm5, %v2149_v35, %v2119_v47  ;;  %v924_v61 = vsel %vm916_vm6, %v2151_v37, %v2124_v52 }
  0x78   : > { %v925_v62 = vsel %vm917_vm7, %v2153_v25, %v2129_v49  ;;  %v926_v63 = vsel %vm918_vm8, %v740_v6, %v2135_v51  ;;  %v1845_v0 = vmov 0   ;;  %vm935_vm9 = vcmp.gt.f32.partialorder %v903_v12, %v919_v54 }
  0x79   : > { %v927_v48 = vsel %vm911_vm1, 1, %v1845_v0  ;;  %v928_v13 = vsel %vm912_vm2, 1, %v1845_v0  ;;  %vm936_vm10 = vcmp.gt.f32.partialorder %v904_v39, %v920_v55  ;;  %v929_v3 = vsel %vm913_vm3, 1, %v1845_v0 }
  0x7a   : > { %v930_v8 = vsel %vm914_vm4, 1, %v1845_v0  ;;  %v931_v9 = vsel %vm915_vm5, 1, %v1845_v0  ;;  %v932_v41 = vsel %vm916_vm6, 1, %v1845_v0  ;;  %v933_v42 = vsel %vm917_vm7, 1, %v1845_v0 }
  0x7b   : > { %v934_v43 = vsel %vm918_vm8, 1, %v1845_v0  ;;  %vm937_vm11 = vcmp.gt.f32.partialorder %v905_v32, %v921_v38  ;;  %vm938_vm12 = vcmp.gt.f32.partialorder %v906_v20, %v922_v59  ;;  %vm939_vm13 = vcmp.gt.f32.partialorder %v907_v53, %v923_v60  ;;  %v2273_v32 = vld [vmem:[%s1956_s8] sm:$0xff] }
  0x7c   : > { %vm940_vm14 = vcmp.gt.f32.partialorder %v908_v21, %v924_v61  ;;  %vm941_vm15 = vcmp.gt.f32.partialorder %v909_v56, %v925_v62  ;;  %vm942_vm0 = vcmp.gt.f32.partialorder %v910_v57, %v926_v63  ;;  %v943_v44 = vsel %vm935_vm9, 2, %v927_v48 }
  0x7d   : > { %v944_v47 = vsel %vm936_vm10, 2, %v928_v13  ;;  %v953_v30 = vlaneseq  ;;  %v945_v23 = vsel %vm937_vm11, 2, %v929_v3  ;;  %v946_v31 = vsel %vm938_vm12, 2, %v930_v8  ;;  %v2350_v8 = vld [vmem:[%s1956_s8 + $0x8] sm:$0xff] }
  0x7e   : > { %v947_v52 = vsel %vm939_vm13, 2, %v931_v9  ;;  %v948_v24 = vsel %vm940_vm14, 2, %v932_v41  ;;  %v949_v35 = vsel %vm941_vm15, 2, %v933_v42  ;;  %v950_v37 = vsel %vm942_vm0, 2, %v934_v43 }
  0x7f   : > { %v955_v49 = vperm.slane %v943_v44, 0  ;;  %v956_v25 = vperm.slane %v943_v44, 4  ;;  %v957_v10 = vperm.slane %v944_v47, 0  ;;  %v958_v51 = vperm.slane %v944_v47, 4 }
  0x80   : > { %v2270_v14 = vshrl.u32 %v953_v30, 7  ;;  %v959_v15 = vperm.slane %v945_v23, 0  ;;  %v960_v16 = vperm.slane %v945_v23, 4  ;;  %v961_v17 = vperm.slane %v946_v31, 0 }
  0x81   : > { %v962_v58 = vperm.slane %v946_v31, 4  ;;  %v963_v18 = vperm.slane %v947_v52, 0  ;;  %v964_v19 = vperm.slane %v947_v52, 4  ;;  %v965_v22 = vperm.slane %v948_v24, 0 }
  0x82   : > { %v966_v26 = vperm.slane %v948_v24, 4  ;;  %v967_v29 = vperm.slane %v949_v35, 0  ;;  %v968_v27 = vperm.slane %v949_v35, 4  ;;  %v969_v1 = vperm.slane %v950_v37, 0 }
  0x83   : > { %v970_v2 = vperm.slane %v950_v37, 4  ;;  %v971_v28 = vperm.slane %v955_v49, 0  ;;  %v972_v40 = vperm.slane %v956_v25, 0  ;;  %v973_v4 = vperm.slane %v957_v10, 0 }
  0x84   : > { %v974_v36 = vperm.slane %v958_v51, 0  ;;  %v975_v5 = vperm.slane %v959_v15, 0  ;;  %v976_v45 = vperm.slane %v960_v16, 0  ;;  %v977_v6 = vperm.slane %v961_v17, 0 }
  0x85   : > { %v978_v46 = vperm.slane %v962_v58, 0  ;;  %v979_v50 = vperm.slane %v963_v18, 0  ;;  %v980_v33 = vperm.slane %v964_v19, 0  ;;  %v981_v34 = vperm.slane %v965_v22, 0 }
  0x86   : > { %v982_v7 = vperm.slane %v966_v26, 0  ;;  %v983_v11 = vperm.slane %v967_v29, 0  ;;  %v984_v12 = vperm.slane %v968_v27, 0  ;;  %v985_v39 = vperm.slane %v969_v1, 0 }
  0x87   : > { %v986_v20 = vperm.slane %v970_v2, 0  ;;  %vm987_vm1 = vcmp.eq.s32.totalorder %v2270_v14, %v971_v28  ;;  %vm988_vm2 = vcmp.eq.s32.totalorder %v2270_v14, %v972_v40  ;;  %vm989_vm3 = vcmp.eq.s32.totalorder %v2270_v14, %v973_v4 }
  0x88   : > { %vm990_vm4 = vcmp.eq.s32.totalorder %v2270_v14, %v974_v36  ;;  %vm991_vm5 = vcmp.eq.s32.totalorder %v2270_v14, %v975_v5  ;;  %vm992_vm6 = vcmp.eq.s32.totalorder %v2270_v14, %v976_v45  ;;  %vm993_vm7 = vcmp.eq.s32.totalorder %v2270_v14, %v977_v6 }
  0x89   : > { %vm994_vm8 = vcmp.eq.s32.totalorder %v2270_v14, %v978_v46  ;;  %vm995_vm9 = vcmp.eq.s32.totalorder %v2270_v14, %v979_v50  ;;  %vm996_vm10 = vcmp.eq.s32.totalorder %v2270_v14, %v980_v33  ;;  %vm997_vm11 = vcmp.eq.s32.totalorder %v2270_v14, %v981_v34 }
  0x8a   : > { %v1035_v53 = vperm.slane %v2273_v32, 0  ;;  %v1036_v21 = vperm.slane %v2273_v32, 1  ;;  %v1037_v54 = vperm.slane %v2273_v32, 2  ;;  %vm998_vm12 = vcmp.eq.s32.totalorder %v2270_v14, %v982_v7 }
  0x8b   : > { %vm999_vm13 = vcmp.eq.s32.totalorder %v2270_v14, %v983_v11  ;;  %vm1000_vm14 = vcmp.eq.s32.totalorder %v2270_v14, %v984_v12  ;;  %vm1001_vm15 = vcmp.eq.s32.totalorder %v2270_v14, %v985_v39  ;;  %vm1002_vm0 = vcmp.eq.s32.totalorder %v2270_v14, %v986_v20 }
  0x8c   : > { %v1846_v55 = vmov 0.0   ;;  %v1038_v38 = vperm.slane %v2273_v32, 3  ;;  %v1039_v63 = vperm.slane %v2273_v32, 4  ;;  %v1040_v42 = vperm.slane %v2273_v32, 5 }
  0x8d   : > { %v2297_v56 = vsel %vm987_vm1, 1.0, %v1846_v55  ;;  %v2302_v57 = vsel %vm988_vm2, 1.0, %v1846_v55  ;;  %v2308_v59 = vsel %vm989_vm3, 1.0, %v1846_v55  ;;  %v2313_v60 = vsel %vm990_vm4, 1.0, %v1846_v55 }
  0x8e   : > { %v2318_v61 = vsel %vm991_vm5, 1.0, %v1846_v55  ;;  %v2323_v62 = vsel %vm992_vm6, 1.0, %v1846_v55  ;;  %vm1051_vm1 = vcmp.eq.s32.totalorder %v2270_v14, %v1035_v53  ;;  %vm1052_vm2 = vcmp.eq.s32.totalorder %v2270_v14, %v1036_v21 }
  0x8f   : > { %vm1053_vm3 = vcmp.eq.s32.totalorder %v2270_v14, %v1037_v54  ;;  %v2332_v0 = vsel %vm993_vm7, 1.0, %v1846_v55  ;;  %v2337_v48 = vsel %vm994_vm8, 1.0, %v1846_v55  ;;  %v2342_v13 = vsel %vm995_vm9, 1.0, %v1846_v55 }
  0x90   : > { %v2347_v3 = vsel %vm996_vm10, 1.0, %v1846_v55  ;;  %v2355_v9 = vsel %vm997_vm11, 1.0, %v1846_v55  ;;  %v2360_v41 = vsel %vm998_vm12, 1.0, %v1846_v55  ;;  %vm1054_vm4 = vcmp.eq.s32.totalorder %v2270_v14, %v1038_v38 }
  0x91   : > { %v2367_v43 = vsel %vm999_vm13, 1.0, %v1846_v55  ;;  %v2370_v44 = vsel %vm1051_vm1, 1.0, %v1846_v55  ;;  %v2373_v47 = vsel %vm1052_vm2, 1.0, %v1846_v55  ;;  %v2376_v30 = vsel %vm1053_vm3, 1.0, %v1846_v55 }
  0x92   : > { %v2381_v23 = vsel %vm1000_vm14, 1.0, %v1846_v55  ;;  %v2386_v31 = vsel %vm1001_vm15, 1.0, %v1846_v55  ;;  %v1041_v52 = vperm.slane %v2273_v32, 6  ;;  %vm1055_vm5 = vcmp.eq.s32.totalorder %v2270_v14, %v1039_v63 }
  0x93   : > { %v2393_v24 = vsel %vm1002_vm0, 1.0, %v1846_v55  ;;  %v1042_v35 = vperm.slane %v2273_v32, 7  ;;  %v1043_v37 = vperm.slane %v2350_v8, 0  ;;  %v2398_v49 = vsel %vm1054_vm4, 1.0, %v1846_v55 }
  0x94   : > { %vm1056_vm6 = vcmp.eq.s32.totalorder %v2270_v14, %v1040_v42  ;;  %v1197_v25 = vmul.f32 %v2370_v44, %v2297_v56  ;;  %v1198_v10 = vmul.f32 %v2373_v47, %v2302_v57  ;;  %v1199_v51 = vmul.f32 %v2376_v30, %v2308_v59 }
  0x95   : > { %v1044_v15 = vperm.slane %v2350_v8, 1  ;;  %v1045_v16 = vperm.slane %v2350_v8, 2  ;;  %v1046_v17 = vperm.slane %v2350_v8, 3  ;;  %v2411_v58 = vsel %vm1055_vm5, 1.0, %v1846_v55 }
  0x96   : > { %v1047_v18 = vperm.slane %v2350_v8, 4  ;;  %v1048_v19 = vperm.slane %v2350_v8, 5  ;;  %vm1057_vm7 = vcmp.eq.s32.totalorder %v2270_v14, %v1041_v52  ;;  %v1200_v22 = vmul.f32 %v2398_v49, %v2313_v60 }
  0x97   : > { %vm1058_vm8 = vcmp.eq.s32.totalorder %v2270_v14, %v1042_v35  ;;  %vm2420_vm9 = vcmp.eq.s32.totalorder %v2270_v14, %v1043_v37  ;;  %v2425_v29 = vsel %vm1056_vm6, 1.0, %v1846_v55  ;;  %vm1213_vm10 = vcmask 1042432  }
  0x98   : > { %v1201_v27 = vmul.f32 %v2411_v58, %v2318_v61  ;;  %v1214_v1 = vsel %vm1213_vm10, %v1197_v25, 0.0  ;;  %v1215_v2 = vsel %vm1213_vm10, %v1198_v10, 0.0  ;;  %v1217_v28 = vsel %vm1213_vm10, %v1199_v51, 0.0 }
  0x99   : > { %v1049_v40 = vperm.slane %v2350_v8, 6  ;;  %v1050_v4 = vperm.slane %v2350_v8, 7  ;;  %v2435_v36 = vsel %vm1057_vm7, 1.0, %v1846_v55  ;;  %v1216_v5 = vadd.f32 %v1215_v2, %v1214_v1 }
  0x9a   : > { %vm2438_vm11 = vcmp.eq.s32.totalorder %v2270_v14, %v1044_v15  ;;  %v2443_v6 = vsel %vm1058_vm8, 1.0, %v1846_v55  ;;  %v1202_v46 = vmul.f32 %v2425_v29, %v2323_v62  ;;  %v1219_v50 = vsel %vm1213_vm10, %v1200_v22, 0.0 }
  0x9b   : > { %vm2449_vm12 = vcmp.eq.s32.totalorder %v2270_v14, %v1045_v16  ;;  %vm2454_vm13 = vcmp.eq.s32.totalorder %v2270_v14, %v1046_v17  ;;  %v2461_v7 = vsel %vm2420_vm9, 1.0, %v1846_v55  ;;  %v1218_v11 = vadd.f32 %v1217_v28, %v1216_v5 }
  0x9c   : > { %v1203_v12 = vmul.f32 %v2435_v36, %v2332_v0  ;;  %v1221_v39 = vsel %vm1213_vm10, %v1201_v27, 0.0  ;;  %v1287_v32 = vsel %vm1213_vm10, %v2370_v44, 0.0  ;;  %v1288_v20 = vsel %vm1213_vm10, %v2373_v47, 0.0 }
  0x9d   : > { %v1204_v53 = vmul.f32 %v2443_v6, %v2337_v48  ;;  %v1220_v21 = vadd.f32 %v1219_v50, %v1218_v11  ;;  %v1289_v54 = vadd.f32 %v1288_v20, %v1287_v32  ;;  %v1290_v38 = vsel %vm1213_vm10, %v2376_v30, 0.0 }
  0x9e   : > { %vm2475_vm14 = vcmp.eq.s32.totalorder %v2270_v14, %v1047_v18  ;;  %v2482_v8 = vsel %vm2438_vm11, 1.0, %v1846_v55  ;;  %v1223_v42 = vsel %vm1213_vm10, %v1202_v46, 0.0  ;;  %v1292_v52 = vsel %vm1213_vm10, %v2398_v49, 0.0 }
  0x9f   : > { %vm2488_vm15 = vcmp.eq.s32.totalorder %v2270_v14, %v1048_v19  ;;  %vm2493_vm0 = vcmp.eq.s32.totalorder %v2270_v14, %v1049_v40  ;;  %v1222_v25 = vadd.f32 %v1221_v39, %v1220_v21  ;;  %v1291_v10 = vadd.f32 %v1290_v38, %v1289_v54 }
  0xa0   : > { %vm2498_vm1 = vcmp.eq.s32.totalorder %v2270_v14, %v1050_v4  ;;  %v2505_v15 = vsel %vm2449_vm12, 1.0, %v1846_v55  ;;  %v1205_v16 = vmul.f32 %v2461_v7, %v2342_v13  ;;  %v1225_v17 = vsel %vm1213_vm10, %v1203_v12, 0.0 }
  0xa1   : > { %v1294_v18 = vsel %vm1213_vm10, %v2411_v58, 0.0  ;;  %v1206_v19 = vmul.f32 %v2482_v8, %v2347_v3  ;;  %v1224_v14 = vadd.f32 %v1223_v42, %v1222_v25  ;;  %v1227_v22 = vsel %vm1213_vm10, %v1204_v53, 0.0 }
  0xa2   : > { %v1293_v26 = vadd.f32 %v1292_v52, %v1291_v10  ;;  %v1296_v27 = vsel %vm1213_vm10, %v2425_v29, 0.0  ;;  %v1251_v1 = vsel %vm1213_vm10, %v2297_v56, 0.0  ;;  %v1252_v2 = vsel %vm1213_vm10, %v2302_v57, 0.0 }
  0xa3   : > { %v1254_v28 = vsel %vm1213_vm10, %v2308_v59, 0.0  ;;  %v2526_v40 = vsel %vm2454_vm13, 1.0, %v1846_v55  ;;  %v1226_v4 = vadd.f32 %v1225_v17, %v1224_v14  ;;  %v1253_v45 = vadd.f32 %v1252_v2, %v1251_v1 }
  0xa4   : > { %v1295_v5 = vadd.f32 %v1294_v18, %v1293_v26  ;;  %v1207_v46 = vmul.f32 %v2505_v15, %v2355_v9  ;;  %v1229_v50 = vsel %vm1213_vm10, %v1205_v16, 0.0  ;;  %v1298_v33 = vsel %vm1213_vm10, %v2435_v36, 0.0 }
  0xa5   : > { %v1256_v11 = vsel %vm1213_vm10, %v2313_v60, 0.0  ;;  %v2538_v34 = vsel %vm2475_vm14, 1.0, %v1846_v55  ;;  %v1228_v12 = vadd.f32 %v1227_v22, %v1226_v4  ;;  %v1255_v32 = vadd.f32 %v1254_v28, %v1253_v45 }
  0xa6   : > { %v1297_v39 = vadd.f32 %v1296_v27, %v1295_v5  ;;  %v1208_v20 = vmul.f32 %v2526_v40, %v2360_v41  ;;  %v1231_v53 = vsel %vm1213_vm10, %v1206_v19, 0.0  ;;  %v1300_v21 = vsel %vm1213_vm10, %v2443_v6, 0.0 }
  0xa7   : > { %v1258_v54 = vsel %vm1213_vm10, %v2318_v61, 0.0  ;;  %v2550_v38 = vsel %vm2488_vm15, 1.0, %v1846_v55  ;;  %v1230_v63 = vadd.f32 %v1229_v50, %v1228_v12  ;;  %v1257_v52 = vadd.f32 %v1256_v11, %v1255_v32 }
  0xa8   : > { %v1299_v42 = vadd.f32 %v1298_v33, %v1297_v39  ;;  %v1209_v25 = vmul.f32 %v2538_v34, %v2367_v43  ;;  %v1233_v10 = vsel %vm1213_vm10, %v1207_v46, 0.0  ;;  %v1302_v16 = vsel %vm1213_vm10, %v2461_v7, 0.0 }
  0xa9   : > { %v1260_v17 = vsel %vm1213_vm10, %v2323_v62, 0.0  ;;  %v2562_v35 = vsel %vm2493_vm0, 1.0, %v1846_v55  ;;  %v1232_v18 = vadd.f32 %v1231_v53, %v1230_v63  ;;  %v1259_v14 = vadd.f32 %v1258_v54, %v1257_v52 }
  0xaa   : > { %v1301_v19 = vadd.f32 %v1300_v21, %v1299_v42  ;;  %v1210_v22 = vmul.f32 %v2550_v38, %v2381_v23  ;;  %v1235_v26 = vsel %vm1213_vm10, %v1208_v20, 0.0  ;;  %v1304_v27 = vsel %vm1213_vm10, %v2482_v8, 0.0 }
  0xab   : > { %v1262_v1 = vsel %vm1213_vm10, %v2332_v0, 0.0  ;;  %v2574_v37 = vsel %vm2498_vm1, 1.0, %v1846_v55  ;;  %v1234_v2 = vadd.f32 %v1233_v10, %v1232_v18  ;;  %v1261_v4 = vadd.f32 %v1260_v17, %v1259_v14 }
  0xac   : > { %v1303_v28 = vadd.f32 %v1302_v16, %v1301_v19  ;;  %v1211_v5 = vmul.f32 %v2562_v35, %v2386_v31  ;;  %v1237_v45 = vsel %vm1213_vm10, %v1209_v25, 0.0  ;;  %v1306_v46 = vsel %vm1213_vm10, %v2505_v15, 0.0 }
  0xad   : > { %v1264_v50 = vsel %vm1213_vm10, %v2337_v48, 0.0  ;;  %v1236_v33 = vadd.f32 %v1235_v26, %v1234_v2  ;;  %v1263_v12 = vadd.f32 %v1262_v1, %v1261_v4  ;;  %v1212_v55 = vmul.f32 %v2574_v37, %v2393_v24 }
  0xae   : > { %v1305_v11 = vadd.f32 %v1304_v27, %v1303_v28  ;;  %v1239_v51 = vsel %vm1213_vm10, %v1210_v22, 0.0  ;;  %v1308_v39 = vsel %vm1213_vm10, %v2526_v40, 0.0  ;;  %v1266_v32 = vsel %vm1213_vm10, %v2342_v13, 0.0 }
  0xaf   : > { %v1238_v20 = vadd.f32 %v1237_v45, %v1236_v33  ;;  %v1265_v21 = vadd.f32 %v1264_v50, %v1263_v12  ;;  %v1241_v54 = vsel %vm1213_vm10, %v1211_v5, 0.0  ;;  %v1310_v63 = vsel %vm1213_vm10, %v2538_v34, 0.0 }
  0xb0   : > { %v1307_v53 = vadd.f32 %v1306_v46, %v1305_v11  ;;  %v1268_v42 = vsel %vm1213_vm10, %v2347_v3, 0.0  ;;  %v1243_v16 = vsel %vm1213_vm10, %v1212_v55, 0.0  ;;  %v1312_v17 = vsel %vm1213_vm10, %v2550_v38, 0.0 }
  0xb1   : > { %v1240_v52 = vadd.f32 %v1239_v51, %v1238_v20  ;;  %v1267_v10 = vadd.f32 %v1266_v32, %v1265_v21  ;;  %v1270_v18 = vsel %vm1213_vm10, %v2355_v9, 0.0  ;;  %v1314_v26 = vsel %vm1213_vm10, %v2562_v35, 0.0 }
  0xb2   : > { %v1309_v25 = vadd.f32 %v1308_v39, %v1307_v53  ;;  %v1272_v27 = vsel %vm1213_vm10, %v2360_v41, 0.0  ;;  %v1316_v4 = vsel %vm1213_vm10, %v2574_v37, 0.0  ;;  %v1274_v5 = vsel %vm1213_vm10, %v2367_v43, 0.0 }
  0xb3   : > { %v1242_v19 = vadd.f32 %v1241_v54, %v1240_v52  ;;  %v1269_v22 = vadd.f32 %v1268_v42, %v1267_v10  ;;  %v1276_v50 = vsel %vm1213_vm10, %v2381_v23, 0.0  ;;  %v1278_v12 = vsel %vm1213_vm10, %v2386_v31, 0.0 }
  0xb4   : > { %v1311_v14 = vadd.f32 %v1310_v63, %v1309_v25  ;;  %v1280_v51 = vsel %vm1213_vm10, %v2393_v24, 0.0  ;;  %v1115_v20 = vrot.slane %v2302_v57, 4  ;;  %v1116_v53 = vrot.slane %v2313_v60, 4 }
  0xb5   : > { %v1244_v1 = vadd.f32 %v1243_v16, %v1242_v19  ;;  %v1271_v28 = vadd.f32 %v1270_v18, %v1269_v22  ;;  %v1117_v21 = vrot.slane %v2323_v62, 4  ;;  %v1118_v54 = vrot.slane %v2337_v48, 4 }
  0xb6   : > { %v1313_v2 = vadd.f32 %v1312_v17, %v1311_v14  ;;  %v1119_v63 = vrot.slane %v2347_v3, 4  ;;  %v1120_v42 = vrot.slane %v2360_v41, 4  ;;  %vm1123_vm2 = vcmask 1043456  }
  0xb7   : > { %1245 = vadd.xlane.f32.xlu0 %v1244_v1  ;;  %v1273_v46 = vadd.f32 %v1272_v27, %v1271_v28  ;;  %v1121_v52 = vrot.slane %v2381_v23, 4  ;;  %v1124_v25 = vsel %vm1123_vm2, %v2297_v56, %v1115_v20  ;;  %v1125_v57 = vsel %vm1123_vm2, %v2308_v59, %v1116_v53 }
  0xb8   : > { %v1315_v45 = vadd.f32 %v1314_v26, %v1313_v2  ;;  %v1126_v60 = vsel %vm1123_vm2, %v2318_v61, %v1117_v21  ;;  %v1122_v62 = vrot.slane %v2393_v24, 4  ;;  %v1127_v48 = vsel %vm1123_vm2, %v2332_v0, %v1118_v54  ;;  %1140 = vst [vmem:[%s1964_s22] sm:$0x77] %v1124_v25 }
  0xb9   : > { %v1275_v11 = vadd.f32 %v1274_v5, %v1273_v46  ;;  %v1128_v3 = vsel %vm1123_vm2, %v2342_v13, %v1119_v63  ;;  %1141 = vst [vmem:[%s1964_s22 + $0x8] sm:$0x77] %v1125_v57  ;;  %v1164_v56 = vrot.slane %v2373_v47, 4  ;;  %v1129_v59 = vsel %vm1123_vm2, %v2355_v9, %v1120_v42 }
  0xba   : > { %v1317_v33 = vadd.f32 %v1316_v4, %v1315_v45  ;;  %1142 = vst [vmem:[%s1964_s22 + $0x10] sm:$0x77] %v1126_v60  ;;  %v1165_v61 = vrot.slane %v2398_v49, 4  ;;  %v1130_v41 = vsel %vm1123_vm2, %v2367_v43, %v1121_v52  ;;  %v1166_v0 = vrot.slane %v2425_v29, 4 }
  0xbb   : > { %v1277_v55 = vadd.f32 %v1276_v50, %v1275_v11  ;;  %1143 = vst [vmem:[%s1964_s22 + $0x18] sm:$0x77] %v1127_v48  ;;  %v1131_v13 = vsel %vm1123_vm2, %v2386_v31, %v1122_v62  ;;  %v1167_v47 = vrot.slane %v2443_v6, 4  ;;  %v1168_v9 = vrot.slane %v2482_v8, 4 }
  0xbc   : > { %1318 = vadd.xlane.f32.xlu1 %v1317_v33  ;;  %1144 = vst [vmem:[%s1964_s22 + $0x20] sm:$0x77] %v1128_v3  ;;  %v1172_v23 = vsel %vm1123_vm2, %v2370_v44, %v1164_v56  ;;  %v1169_v43 = vrot.slane %v2526_v40, 4  ;;  %v1173_v31 = vsel %vm1123_vm2, %v2376_v30, %v1165_v61  ;;  %v1170_v24 = vrot.slane %v2550_v38, 4  ;;  %v1286_v38 = vld [vmem:[#allocation4] sm:$0x7] }
  0xbd   : > { %v1279_v39 = vadd.f32 %v1278_v12, %v1277_v55  ;;  %1145 = vst [vmem:[%s1964_s22 + $0x28] sm:$0x77] %v1129_v59  ;;  %v1174_v49 = vsel %vm1123_vm2, %v2411_v58, %v1166_v0  ;;  %v1171_v29 = vrot.slane %v2574_v37, 4  ;;  %v1175_v44 = vsel %vm1123_vm2, %v2435_v36, %v1167_v47  ;;  %v1196_v36 = vld [vmem:[#allocation2] sm:$0x7] }
  0xbe   : > { %1146 = vst [vmem:[%s1964_s22 + $0x30] sm:$0x77] %v1130_v41  ;;  %v1176_v6 = vsel %vm1123_vm2, %v2461_v7, %v1168_v9  ;;  %v1177_v30 = vsel %vm1123_vm2, %v2505_v15, %v1169_v43  ;;  %v1178_v8 = vsel %vm1123_vm2, %v2538_v34, %v1170_v24  ;;  %vm1248_vm3 = vcmask 2048   ;;  %v1250_v34 = vld [vmem:[#allocation3] sm:$0x7] }
  0xbf   : > { %v1281_v32 = vadd.f32 %v1280_v51, %v1279_v39  ;;  %1147 = vst [vmem:[%s1964_s22 + $0x38] sm:$0x77] %v1131_v13  ;;  %v1179_v58 = vsel %vm1123_vm2, %v2562_v35, %v1171_v29 }
  0xc0   : > { %1188 = vst [vmem:[%s1969_s16] sm:$0x77] %v1172_v23 }
  0xc1   : > { %1282 = vadd.xlane.f32.xlu0 %v1281_v32  ;;  %1189 = vst [vmem:[%s1969_s16 + $0x8] sm:$0x77] %v1173_v31 }
  0xc2   : > { %1190 = vst [vmem:[%s1969_s16 + $0x10] sm:$0x77] %v1174_v49 }
  0xc3   : > { %1191 = vst [vmem:[%s1969_s16 + $0x18] sm:$0x77] %v1175_v44 }
  0xc4   : > { %1192 = vst [vmem:[%s1969_s16 + $0x20] sm:$0x77] %v1176_v6 }
  0xc5   : > { %1193 = vst [vmem:[%s1969_s16 + $0x28] sm:$0x77] %v1177_v30 }
  0xc6   : > { %1194 = vst [vmem:[%s1969_s16 + $0x30] sm:$0x77] %v1178_v8 }
  0xc7   : > { %1195 = vst [vmem:[%s1969_s16 + $0x38] sm:$0x77] %v1179_v58 }
 0x12a   : > { %v1246_v40 = vpop.xlane.xlu0 %1245 }
 0x12b   : > { %v1247_v7 = vadd.f32 %v1246_v40, %v1196_v36 }
 0x12d   : > { %1249 = vst.msk [vmem:[#allocation2] sm:$0x7] %vm1248_vm3, %v1247_v7 }
 0x12f   : > { %v1319_v15 = vpop.xlane.xlu1 %1318 }
 0x130   : > { %v1320_v37 = vadd.f32 %v1319_v15, %v1286_v38 }
 0x132   : > { %1321 = vst.msk [vmem:[#allocation4] sm:$0x7] %vm1248_vm3, %v1320_v37 }
 0x133   : > { %1325 = sbr.rel (%p1695_p11) target bundleno = 343 (0x157), region = 52 }
 0x134   : > { %v1283_v10 = vpop.xlane.xlu0 %1282 }
 0x135   : > { %v1284_v16 = vadd.f32 %v1283_v10, %v1250_v34 }
 0x137   : > { %1285 = vst.msk [vmem:[#allocation3] sm:$0x7] %vm1248_vm3, %v1284_v16 }
 0x138   : > { %v1326_v2 = vld [vmem:[#allocation2] sm:$0x7] }
 0x139   : > { %v1329_v17 = vld [vmem:[#allocation4] sm:$0x7]  ;;  %v1327_v5 = vmul.f32 2.0, %v1326_v2 }
 0x13e   : > { %v1328_v35 = vld [vmem:[#allocation3] sm:$0x7] }
 0x13f   : > { %v1330_v18 = vadd.f32 %v1329_v17, %v1328_v35 }
 0x141   : > { %v1331_v19 = vadd.f32 1e-06, %v1330_v18 }
 0x143   : > { %1762 = vrcp.f32 %v1331_v19  ;;  %v1343_v26 = vand.u32 2147483648, %v1331_v19  ;;  %vm1337_vm4 = vweird.f32 %v1331_v19  ;;  %v1341_v1 = vand.u32 2147483647, %v1331_v19 }
 0x145   : > { %v1344_v4 = vor.u32 1.1754944e-38, %v1343_v26  ;;  %vm1342_vm7 = vcmp.eq.f32.partialorder %v1341_v1, 8.507059e+37 }
 0x149   : > { %v1763_v14 = vpop.eup %1762 }
 0x14a   : > { %v1333_v22 = vmul.f32 %v1763_v14, %v1331_v19  ;;  %vm1338_vm5 = vweird.f32 %v1763_v14 }
 0x14b   : > { %vm1339_vm6 = vmor %vm1337_vm4, %vm1338_vm5 }
 0x14c   : > { %v1334_v27 = vsub.f32 1.0, %v1333_v22 }
 0x14e   : > { %v1335_v28 = vmul.f32 %v1763_v14, %v1334_v27 }
 0x150   : > { %v1336_v45 = vadd.f32 %v1763_v14, %v1335_v28 }
 0x152   : > { %v1340_v46 = vsel %vm1339_vm6, %v1763_v14, %v1336_v45 }
 0x153   : > { %v1345_v50 = vsel %vm1342_vm7, %v1344_v4, %v1340_v46 }
 0x154   : > { %v1346_v33 = vmul.f32 %v1345_v50, %v1327_v5 }
 0x156   : > { %1347 = vst.msk [vmem:[%s1951_s26] sm:$0x7] %vm1248_vm3, %v1346_v33 }
 0x157 PF: > { %s19_s25 = sadd.s32 1, %s1840_s25   ;;  %s2724_s21 = smov %s1832_s23 }
 0x158   : > { %p16_p12 = scmp.ge.s32.totalorder %s19_s25, 6   ;;  %s2725_s22 = smov %s1836_s24 }
 0x159   : > { %s2726_s23 = smov %s2729_s27  ;;  %s2727_s24 = smov %s2733_s28 }
 0x15a   :  { %18 = sbr.rel (!%p16_p12) target bundleno = 4 (0x4), region = 110 }
 0x15f   :  { %1417 = vsyncpa [#allocation6], 1 }
 0x160   :  { %1419 = vsyncpa [#allocation6 + $0x1], 1 }
 0x161   :  { %1420 = vsyncpa [#allocation8], 1 }

</bundles_post_ra>
